<compile_context>
chip_gen: v7x
topology: tpu7x:2x2x1
jax: 0.10.0
libtpu: 0.0.40
codegen_flags: <defaults>
</compile_context>

<pallas_src>
import jax
import jax.numpy as jnp
from jax.experimental import pallas as pl
from jax.experimental.pallas import tpu as pltpu


def _round_up(x, m):
    return (x + m - 1) // m * m


def ffnn_kernel(x_ref, w1_ref, b1_ref, w2_ref, b2_ref, w3_ref, b3_ref, o_ref):
    # Layer 1: fc1 (+ folded BN1) + ReLU.  Dropout is identity in eval mode.
    h1 = jnp.dot(x_ref[...], w1_ref[...],
                 preferred_element_type=jnp.float32) + b1_ref[...]
    h1 = jnp.maximum(h1, 0.0)
    # Layer 2: fc2 (+ folded BN2) + ReLU.  Dropout is identity in eval mode.
    h2 = jnp.dot(h1.astype(w2_ref.dtype), w2_ref[...],
                 preferred_element_type=jnp.float32) + b2_ref[...]
    h2 = jnp.maximum(h2, 0.0)
    # Layer 3: fc3 (output columns are zero-padded to a lane-dense width).
    o_ref[...] = (jnp.dot(h2.astype(w3_ref.dtype), w3_ref[...],
                          preferred_element_type=jnp.float32)
                  + b3_ref[...]).astype(o_ref.dtype)


def feedforward_nn(x, params, *, block_b=512, compute_dtype=jnp.float32):
    """x: (B, input_dim) float32.  params: dict from init_params (PyTorch layout)."""
    B, in_dim = x.shape
    hidden = params["w1"].shape[1]
    h2_dim = params["w2"].shape[1]
    out_dim = params["w3"].shape[1]

    # --- host-side fold of eval-mode BatchNorm into the linear layers -------
    w1 = (params["w1"] * params["s1"]).astype(compute_dtype)
    b1 = (params["b1"] * params["s1"] + params["t1"]).astype(jnp.float32)
    w2 = (params["w2"] * params["s2"]).astype(compute_dtype)
    b2 = (params["b2"] * params["s2"] + params["t2"]).astype(jnp.float32)

    # --- pad fc3 columns so output stores are lane-dense (multiple of 128) --
    out_pad = _round_up(out_dim, 128)
    w3 = jnp.zeros((h2_dim, out_pad), compute_dtype)
    w3 = w3.at[:, :out_dim].set(params["w3"].astype(compute_dtype))
    b3 = jnp.zeros((1, out_pad), jnp.float32)
    b3 = b3.at[:, :out_dim].set(params["b3"].astype(jnp.float32))

    # --- batch tiling (tile multiple of 16 covers f32 & bf16 sublane rules) -
    tb = min(block_b, _round_up(B, 16))
    b_pad = _round_up(B, tb)
    x_p = x.astype(compute_dtype)
    if b_pad != B:
        x_p = jnp.zeros((b_pad, in_dim), compute_dtype).at[:B].set(x_p)

    grid = (b_pad // tb,)

    def const_spec(shape):
        # weights / biases: same block every grid step -> stay resident in VMEM
        return pl.BlockSpec(shape, lambda i: (0,) * len(shape))

    itemsize = jnp.dtype(compute_dtype).itemsize
    flops = 2 * b_pad * (in_dim * hidden + hidden * h2_dim + h2_dim * out_pad)
    bytes_accessed = int(
        b_pad * in_dim * itemsize                      # x
        + (in_dim * hidden + hidden * h2_dim + h2_dim * out_pad) * itemsize  # weights
        + (hidden + h2_dim + out_pad) * 4              # biases (f32)
        + b_pad * out_pad * 4)                         # output (f32)

    out = pl.pallas_call(
        ffnn_kernel,
        out_shape=jax.ShapeDtypeStruct((b_pad, out_pad), jnp.float32),
        grid=grid,
        in_specs=[
            pl.BlockSpec((tb, in_dim), lambda i: (i, 0)),   # x: batch-tiled
            const_spec(w1.shape), const_spec(b1.shape),
            const_spec(w2.shape), const_spec(b2.shape),
            const_spec(w3.shape), const_spec(b3.shape),
        ],
        out_specs=pl.BlockSpec((tb, out_pad), lambda i: (i, 0)),
        compiler_params=pltpu.CompilerParams(
            dimension_semantics=("parallel",),          # megacore-shardable batch axis
            vmem_limit_bytes=48 * 1024 * 1024,          # headroom vs v7x 64 MiB VMEM
        ),
        cost_estimate=pl.CostEstimate(
            flops=flops, transcendentals=0, bytes_accessed=bytes_accessed),
    )(x_p, w1, b1, w2, b2, w3, b3)

    return out[:B, :out_dim]


# ----------------------------- parameter setup ------------------------------

def xavier_uniform(key, fan_in, fan_out):
    # torch.nn.init.xavier_uniform_ on a (fan_out, fan_in) weight
    limit = jnp.sqrt(6.0 / (fan_in + fan_out))
    w = jax.random.uniform(key, (fan_out, fan_in),
                           minval=-limit, maxval=limit, dtype=jnp.float32)
    return w.T  # store as (in, out) so the kernel does row-major x @ W


def linear_bias(key, fan_in, fan_out):
    # PyTorch Linear default bias init: U(-1/sqrt(fan_in), 1/sqrt(fan_in))
    bound = 1.0 / jnp.sqrt(jnp.float32(fan_in))
    return jax.random.uniform(key, (1, fan_out),
                              minval=-bound, maxval=bound, dtype=jnp.float32)


def bn_fold(gamma, beta, running_mean, running_var, eps=1e-5):
    # Eval-mode BatchNorm1d as per-feature scale & shift.
    scale = gamma / jnp.sqrt(running_var + eps)
    shift = beta - running_mean * scale
    return scale[None, :], shift[None, :]


def init_params(key, input_dim, hidden_dim, output_dim):
    h2 = hidden_dim // 2
    keys = jax.random.split(key, 6)
    w1 = xavier_uniform(keys[0], input_dim, hidden_dim)
    b1 = linear_bias(keys[1], input_dim, hidden_dim)
    w2 = xavier_uniform(keys[2], hidden_dim, h2)
    b2 = linear_bias(keys[3], hidden_dim, h2)
    w3 = xavier_uniform(keys[4], h2, output_dim)
    b3 = linear_bias(keys[5], h2, output_dim)
    # BatchNorm params at their PyTorch defaults (gamma=1, beta=0, mean=0, var=1)
    s1, t1 = bn_fold(jnp.ones(hidden_dim), jnp.zeros(hidden_dim),
                     jnp.zeros(hidden_dim), jnp.ones(hidden_dim))
    s2, t2 = bn_fold(jnp.ones(h2), jnp.zeros(h2),
                     jnp.zeros(h2), jnp.ones(h2))
    return dict(w1=w1, b1=b1, s1=s1, t1=t1,
                w2=w2, b2=b2, s2=s2, t2=t2,
                w3=w3, b3=b3)


def feedforward_nn_ref(x, p):
    # Unfolded reference (BN applied after the matmul) — verifies the folding.
    h1 = jnp.maximum((x @ p["w1"] + p["b1"]) * p["s1"] + p["t1"], 0.0)
    h2 = jnp.maximum((h1 @ p["w2"] + p["b2"]) * p["s2"] + p["t2"], 0.0)
    return h2 @ p["w3"] + p["b3"]


if __name__ == "__main__":
    key = jax.random.PRNGKey(0)
    k_x, k_p = jax.random.split(key)

    batch, input_dim, hidden_dim, output_dim = 8, 32, 32, 8
    x = jax.random.normal(k_x, (batch, input_dim), dtype=jnp.float32)
    params = init_params(k_p, input_dim, hidden_dim, output_dim)

    ref = feedforward_nn_ref(x, params)

    # f32 matmul path (bit-accurate vs reference up to reassociation error)
    out_f32 = jax.block_until_ready(feedforward_nn(x, params))
    assert out_f32.shape == (batch, output_dim)
    assert jnp.allclose(out_f32, ref, atol=1e-4, rtol=1e-4)

    # bf16 matmul inputs / f32 accumulate path (v6e/v7x MXU & bandwidth win)
    out_bf16 = jax.block_until_ready(
        feedforward_nn(x, params, compute_dtype=jnp.bfloat16))
    assert out_bf16.shape == (batch, output_dim)
    assert jnp.allclose(out_bf16, ref, atol=5e-2, rtol=5e-2)

    print("KERNEL_OK")
</pallas_src>

<mosaic_0001>
module attributes {stable_mosaic.version = 11 : i64} {
  func.func @ffnn_kernel(%arg0: i32, %arg1: memref<16x32xf32, #tpu.memory_space<vmem>>, %arg2: memref<32x32xf32, #tpu.memory_space<vmem>>, %arg3: memref<1x32xf32, #tpu.memory_space<vmem>>, %arg4: memref<32x16xf32, #tpu.memory_space<vmem>>, %arg5: memref<1x16xf32, #tpu.memory_space<vmem>>, %arg6: memref<16x128xf32, #tpu.memory_space<vmem>>, %arg7: memref<1x128xf32, #tpu.memory_space<vmem>>, %arg8: memref<16x128xf32, #tpu.memory_space<vmem>>) attributes {dimension_semantics = [#tpu.dimension_semantics<parallel>], iteration_bounds = array<i64: 1>, scalar_prefetch = 0 : i64, scratch_operands = 0 : i64, tpu.core_type = #tpu.core_type<tc>, window_params = [{transform_indices = @transform_0, window_bounds = array<i64: 16, 32>}, {pipeline_mode = #tpu.pipeline_mode<synchronous>, transform_indices = @transform_1, window_bounds = array<i64: 32, 32>}, {pipeline_mode = #tpu.pipeline_mode<synchronous>, transform_indices = @transform_2, window_bounds = array<i64: 1, 32>}, {pipeline_mode = #tpu.pipeline_mode<synchronous>, transform_indices = @transform_3, window_bounds = array<i64: 32, 16>}, {pipeline_mode = #tpu.pipeline_mode<synchronous>, transform_indices = @transform_4, window_bounds = array<i64: 1, 16>}, {pipeline_mode = #tpu.pipeline_mode<synchronous>, transform_indices = @transform_5, window_bounds = array<i64: 16, 128>}, {pipeline_mode = #tpu.pipeline_mode<synchronous>, transform_indices = @transform_6, window_bounds = array<i64: 1, 128>}, {transform_indices = @transform_7, window_bounds = array<i64: 16, 128>}]} {
    %c0 = arith.constant 0 : index
    %c0_0 = arith.constant 0 : index
    %0 = vector.load %arg1[%c0, %c0_0] : memref<16x32xf32, #tpu.memory_space<vmem>>, vector<16x32xf32>
    %c0_1 = arith.constant 0 : index
    %c0_2 = arith.constant 0 : index
    %1 = vector.load %arg2[%c0_1, %c0_2] : memref<32x32xf32, #tpu.memory_space<vmem>>, vector<32x32xf32>
    %cst = arith.constant dense<0.000000e+00> : vector<16x32xf32>
    %2 = tpu.matmul %0, %1, %cst {dimension_numbers = #tpu.dot_dimension_numbers<[1], [0], [0], [1], [0, 0, 1, 1], [], []>} : vector<16x32xf32>, vector<32x32xf32>, vector<16x32xf32> -> vector<16x32xf32>
    %c0_3 = arith.constant 0 : index
    %c0_4 = arith.constant 0 : index
    %3 = vector.load %arg3[%c0_3, %c0_4] : memref<1x32xf32, #tpu.memory_space<vmem>>, vector<1x32xf32>
    %4 = vector.broadcast %3 : vector<1x32xf32> to vector<16x32xf32>
    %5 = arith.addf %2, %4 : vector<16x32xf32>
    %cst_5 = arith.constant 0.000000e+00 : f32
    %6 = vector.broadcast %cst_5 : f32 to vector<16x32xf32>
    %7 = arith.maximumf %5, %6 : vector<16x32xf32>
    %c0_6 = arith.constant 0 : index
    %c0_7 = arith.constant 0 : index
    %8 = vector.load %arg4[%c0_6, %c0_7] : memref<32x16xf32, #tpu.memory_space<vmem>>, vector<32x16xf32>
    %cst_8 = arith.constant dense<0.000000e+00> : vector<16x16xf32>
    %9 = tpu.matmul %7, %8, %cst_8 {dimension_numbers = #tpu.dot_dimension_numbers<[1], [0], [0], [1], [0, 0, 1, 1], [], []>} : vector<16x32xf32>, vector<32x16xf32>, vector<16x16xf32> -> vector<16x16xf32>
    %c0_9 = arith.constant 0 : index
    %c0_10 = arith.constant 0 : index
    %10 = vector.load %arg5[%c0_9, %c0_10] : memref<1x16xf32, #tpu.memory_space<vmem>>, vector<1x16xf32>
    %11 = vector.broadcast %10 : vector<1x16xf32> to vector<16x16xf32>
    %12 = arith.addf %9, %11 : vector<16x16xf32>
    %cst_11 = arith.constant 0.000000e+00 : f32
    %13 = vector.broadcast %cst_11 : f32 to vector<16x16xf32>
    %14 = arith.maximumf %12, %13 : vector<16x16xf32>
    %c0_12 = arith.constant 0 : index
    %c0_13 = arith.constant 0 : index
    %15 = vector.load %arg6[%c0_12, %c0_13] : memref<16x128xf32, #tpu.memory_space<vmem>>, vector<16x128xf32>
    %cst_14 = arith.constant dense<0.000000e+00> : vector<16x128xf32>
    %16 = tpu.matmul %14, %15, %cst_14 {dimension_numbers = #tpu.dot_dimension_numbers<[1], [0], [0], [1], [0, 0, 1, 1], [], []>} : vector<16x16xf32>, vector<16x128xf32>, vector<16x128xf32> -> vector<16x128xf32>
    %c0_15 = arith.constant 0 : index
    %c0_16 = arith.constant 0 : index
    %17 = vector.load %arg7[%c0_15, %c0_16] : memref<1x128xf32, #tpu.memory_space<vmem>>, vector<1x128xf32>
    %18 = vector.broadcast %17 : vector<1x128xf32> to vector<16x128xf32>
    %19 = arith.addf %16, %18 : vector<16x128xf32>
    %c0_17 = arith.constant 0 : index
    %c0_18 = arith.constant 0 : index
    %20 = vector.load %arg8[%c0_17, %c0_18] : memref<16x128xf32, #tpu.memory_space<vmem>>, vector<16x128xf32>
    tpu.vector_store %arg8[%c0_17, %c0_18], %19 {strides = array<i32>} : memref<16x128xf32, #tpu.memory_space<vmem>>, vector<16x128xf32>,
    return
  }
  func.func @transform_0(%arg0: i32) -> (i32, i32) {
    %c0_i32 = arith.constant 0 : i32
    %c0_i32_0 = arith.constant 0 : i32
    return %arg0, %c0_i32 : i32, i32
  }
  func.func @transform_1(%arg0: i32) -> (i32, i32) {
    %c0_i32 = arith.constant 0 : i32
    %c0_i32_0 = arith.constant 0 : i32
    %c0_i32_1 = arith.constant 0 : i32
    return %c0_i32, %c0_i32_0 : i32, i32
  }
  func.func @transform_2(%arg0: i32) -> (i32, i32) {
    %c0_i32 = arith.constant 0 : i32
    %c0_i32_0 = arith.constant 0 : i32
    %c0_i32_1 = arith.constant 0 : i32
    return %c0_i32, %c0_i32_0 : i32, i32
  }
  func.func @transform_3(%arg0: i32) -> (i32, i32) {
    %c0_i32 = arith.constant 0 : i32
    %c0_i32_0 = arith.constant 0 : i32
    %c0_i32_1 = arith.constant 0 : i32
    return %c0_i32, %c0_i32_0 : i32, i32
  }
  func.func @transform_4(%arg0: i32) -> (i32, i32) {
    %c0_i32 = arith.constant 0 : i32
    %c0_i32_0 = arith.constant 0 : i32
    %c0_i32_1 = arith.constant 0 : i32
    return %c0_i32, %c0_i32_0 : i32, i32
  }
  func.func @transform_5(%arg0: i32) -> (i32, i32) {
    %c0_i32 = arith.constant 0 : i32
    %c0_i32_0 = arith.constant 0 : i32
    %c0_i32_1 = arith.constant 0 : i32
    return %c0_i32, %c0_i32_0 : i32, i32
  }
  func.func @transform_6(%arg0: i32) -> (i32, i32) {
    %c0_i32 = arith.constant 0 : i32
    %c0_i32_0 = arith.constant 0 : i32
    %c0_i32_1 = arith.constant 0 : i32
    return %c0_i32, %c0_i32_0 : i32, i32
  }
  func.func @transform_7(%arg0: i32) -> (i32, i32) {
    %c0_i32 = arith.constant 0 : i32
    %c0_i32_0 = arith.constant 0 : i32
    return %arg0, %c0_i32 : i32, i32
  }
}

</mosaic_0001>

<bundles_post_ra>
// kernel: tpu_custom_call.1
= control target key start
LH: loop header
LB: loop body
LE: loop exit
PB: predicated region body
PF: predicated region fallthrough
CT: control target
= control target key end

     0   :  { %vm40_vm0 = vcmask 261120   ;;  %s532_s0 = inlined_call_operand.vmem [shape: f32[16,32], index: 0, kind: input, shape index: {}]   ;;  %s533_s1 = inlined_call_operand.vmem [shape: f32[32,32], index: 1, kind: input, shape index: {}]   ;;  %s534_s2 = inlined_call_operand.vmem [shape: f32[1,32], index: 2, kind: input, shape index: {}]   ;;  %s535_s3 = inlined_call_operand.vmem [shape: f32[32,16], index: 3, kind: input, shape index: {}]   ;;  %s536_s4 = inlined_call_operand.vmem [shape: f32[1,16], index: 4, kind: input, shape index: {}]   ;;  %s537_s5 = inlined_call_operand.vmem [shape: f32[16,128], index: 5, kind: input, shape index: {}]   ;;  %s538_s6 = inlined_call_operand.vmem [shape: f32[1,128], index: 6, kind: input, shape index: {}]   ;;  %s539_s7 = inlined_call_operand.hbm [shape: f32[16,128], index: 7, kind: output, shape index: {}]  }
   0x1   :  { %v29_v0 = vld [vmem:[%s533_s1] sm:$0xff]  ;;  %v30_v1 = vld [vmem:[%s533_s1 + $0x8] sm:$0xff]  ;;  %v31_v2 = vld [vmem:[%s533_s1 + $0x10] sm:$0xff] }
   0x2   :  { %v381_v3 = vpack.c.bf16 %v30_v1, %v29_v0  ;;  %v32_v4 = vld [vmem:[%s533_s1 + $0x18] sm:$0xff]  ;;  %v27_v5 = vld [vmem:[%s532_s0] sm:$0xff]  ;;  %v125_v8 = vld [vmem:[%s535_s3 + $0x8] sm:$0xff] }
   0x3   :  { %v385_v6 = vpack.c.bf16 %v32_v4, %v31_v2  ;;  %360 = vmatprep.mubr.msk.f32.mxu0 %vm40_vm0, %v27_v5  ;;  %v124_v7 = vld [vmem:[%s535_s3] sm:$0xff] }
   0x4   :  { %12 = vsyncpa [#allocation3], 0  ;;  %382 = vmatprep.subr.bf16.mxu0 %v381_v3  ;;  %v389_v9 = vpack.c.bf16 %v125_v8, %v124_v7  ;;  %v28_v10 = vld [vmem:[%s532_s0 + $0x8] sm:$0xff]  ;;  %v126_v11 = vld [vmem:[%s535_s3 + $0x10] sm:$0xff]  ;;  %vm227_vm1 = vcmask 130048  }
   0x5   :  { %384 = vmatpush3.bf16.msra.mxu0 %v381_v3  ;;  %v127_v12 = vld [vmem:[%s535_s3 + $0x18] sm:$0xff]  ;;  %v327_v14 = vld [vmem:[%s534_s2] ss:$0 sm:$0xff]  ;;  %v219_v22 = vld [vmem:[%s537_s5 + $0x8] sm:$0xff] }
   0x6   :  { %386 = vmatprep.subr.bf16.mxu0 %v385_v6  ;;  %390 = vmatprep.subr.bf16.mxu1 %v389_v9  ;;  %v393_v13 = vpack.c.bf16 %v127_v12, %v126_v11  ;;  %v218_v21 = vld [vmem:[%s537_s5] sm:$0xff]  ;;  %s428_s5 = smov [#allocation2]  }
   0x7   :  { %392 = vmatpush3.bf16.msra.mxu1 %v389_v9  ;;  %v397_v23 = vpack.c.bf16 %v219_v22, %v218_v21  ;;  %v330_v24 = vld [vmem:[%s536_s4] ss:$0 sm:$0xff]  ;;  %s316_s27 = sshll.u32 %s428_s5, 4  ;;  %s317_s27 = int_to_ptr.vmem [resolvable:$true] %s316_s27 }
   0x8   :  { %394 = vmatprep.subr.bf16.mxu1 %v393_v13  ;;  %v333_v31 = vld [vmem:[%s538_s6] ss:$0 sm:$0xff]  ;;  %s404_s4 = scalar_lea.vmem %s317_s27, 256  ;;  %p409_p1 = scmp.lt.s32.totalorder %s317_s27, %s317_s27 }
   0x9   :  { %388 = vmatpush3.bf16.msra.mxu0 %v385_v6  ;;  %p405_p0 = scmp.ne.s32.totalorder %s317_s27, %s404_s4  ;;  %p410_p2 = scmp.lt.s32.totalorder %s404_s4, %s404_s4 }
   0xa   :  { %398 = vmatprep.subr.bf16.mxu0 %v397_v23 }
   0xb   :  { %396 = vmatpush3.bf16.msra.mxu1 %v393_v13  ;;  %p411_p3 = por %p410_p2, %p409_p1 }
   0xc   :  { %361 = vmatmul.mubr.msk.f32.vlgmr.msra.gmra.mrb[0].mxu0 %vm40_vm0, %v28_v10 }
   0xd   :  { %400 = vmatpush3.bf16.msra.mxu0 %v397_v23  ;;  %p412_p4 = pnand %p411_p3, %p405_p0 }
  0xdf   :  { %v362_v15 = vpop.f32.mrb[0].mxu0 }
  0xe0   :  { %v119_v16 = vadd.f32 %v362_v15, %v327_v14  ;;  %v113_v17 = vpop.f32.mrb[1].mxu0 }
  0xe1   :  { %v114_v18 = vadd.f32 %v327_v14, %v113_v17 }
  0xe2   :  { %v123_v20 = vmax.f32 %v119_v16, 0.0 }
  0xe3   :  { %v122_v19 = vmax.f32 %v114_v18, 0.0 }
  0xe5   :  { %371 = vmatprep.mubr.msk.f32.mxu1 %vm40_vm0, %v122_v19 }
  0xe6   :  { %372 = vmatmul.mubr.msk.f32.vlgmr.msra.gmra.mrb[0].mxu1 %vm40_vm0, %v123_v20 }
 0x1b9   :  { %v373_v25 = vpop.f32.mrb[0].mxu1 }
 0x1ba   :  { %v213_v26 = vadd.f32 %v373_v25, %v330_v24  ;;  %v207_v27 = vpop.f32.mrb[1].mxu1 }
 0x1bb   :  { %v208_v28 = vadd.f32 %v330_v24, %v207_v27 }
 0x1bc   :  { %v217_v30 = vmax.f32 %v213_v26, 0.0 }
 0x1bd   :  { %v216_v29 = vmax.f32 %v208_v28, 0.0 }
 0x1bf   :  { %378 = vmatprep.mubr.msk.f32.mxu0 %vm227_vm1, %v216_v29 }
 0x1c0   :  { %379 = vmatmul.mubr.msk.f32.vlgmr.msra.gmra.mrb[2].mxu0 %vm227_vm1, %v217_v30 }
 0x293   :  { %v380_v32 = vpop.f32.mrb[2].mxu0 }
 0x294   :  { %v306_v33 = vadd.f32 %v380_v32, %v333_v31  ;;  %v300_v34 = vpop.f32.mrb[3].mxu0 }
 0x295   :  { %v301_v35 = vadd.f32 %v333_v31, %v300_v34 }
 0x296   :  { %310 = vst [vmem:[#allocation2 + $0x8] sm:$0xff] %v306_v33 }
 0x297   :  { %309 = vst [vmem:[#allocation2] sm:$0xff] %v301_v35 }
 0x298   :  { %415 = shalt.err (!%p412_p4)
}
 0x299   :  { %s416_s6 = scalar_lea.hbm %s539_s7, 256 }
 0x29a   :  { %p417_p5 = scmp.ne.s32.totalorder %s539_s7, %s416_s6  ;;  %p420_p6 = scmp.lt.u32.totalorder %s416_s6, %s539_s7 }
 0x29c   :  { %p422_p7 = pnand %p420_p6, %p417_p5 }
 0x29e   :  { %425 = shalt.err (!%p422_p7)
}
 0x29f   :  { %s429_s11 = smov 128   ;;  %s430_s12 = smov 8  }
 0x2a0   :  { %322 = dma.vmem_to_hbm [thread:$0]  %s317_s27, 256, %s539_s7, [#allocation3], %s429_s11, %s429_s11, %s430_s12  }
 0x2a1   :  { %426 = dma.done.wait [#allocation3], 256  }
 0x2a2   :  { %427 = vsyncadd [#allocation3], 4294967040 }
 0x2a3   :  { %326 = vsyncpa [#allocation3], 1 }

</bundles_post_ra>
